<compile_context>
chip_gen: v5e
topology: v5e:2x2
jax: 0.10.0
libtpu: 0.0.40
codegen_flags: <defaults>
</compile_context>

<pallas_src>
import jax
import jax.numpy as jnp
from jax.experimental import pallas as pl
from jax.experimental.pallas import tpu as pltpu


def _round_up(a: int, b: int) -> int:
    return ((a + b - 1) // b) * b


# -----------------------------------------------------------------------------
# Parameter packing: one (8, 128) f32 slab holding W1, W2, W3 and b1, b2, b3.
#   W1 (6,8)  -> slab[0:6,   0:8 ]
#   W2 (4,6)  -> slab[0:4,   8:14]
#   W3 (1,4)  -> slab[0:1,  14:18]
#   b1 (6,)   -> slab[0:6, 120]      (stored as a column -> broadcasts over lanes)
#   b2 (4,)   -> slab[0:4, 121]
#   b3 (1,)   -> slab[0:1, 122]
# -----------------------------------------------------------------------------
def pack_params(params):
    w1, b1, w2, b2, w3, b3 = params
    slab = jnp.zeros((8, 128), jnp.float32)
    slab = slab.at[0:6, 0:8].set(w1.astype(jnp.float32))
    slab = slab.at[0:4, 8:14].set(w2.astype(jnp.float32))
    slab = slab.at[0:1, 14:18].set(w3.astype(jnp.float32))
    slab = slab.at[0:6, 120].set(b1.astype(jnp.float32))
    slab = slab.at[0:4, 121].set(b2.astype(jnp.float32))
    slab = slab.at[0:1, 122].set(b3.astype(jnp.float32))
    return slab


def mlp_kernel(p_ref, x_ref, o_ref):
    # p_ref: (8, 128) packed params (resident across the whole grid)
    # x_ref: (8, TILE_N) batch tile, batch on lanes
    # o_ref: (1, TILE_N) lane-dense output tile
    p = p_ref[...]
    w1 = p[0:6, 0:8]           # (6, 8)
    w2 = p[0:4, 8:14]          # (4, 6)
    w3 = p[0:1, 14:18]         # (1, 4)
    b1 = p[0:6, 120:121]       # (6, 1) -> broadcasts over lanes
    b2 = p[0:4, 121:122]       # (4, 1)
    b3 = p[0:1, 122:123]       # (1, 1)

    x = x_ref[...]             # (8, TILE_N) f32

    h1 = jax.nn.sigmoid(
        jnp.dot(w1, x, preferred_element_type=jnp.float32) + b1)   # (6, TILE_N)
    h2 = jax.nn.sigmoid(
        jnp.dot(w2, h1, preferred_element_type=jnp.float32) + b2)  # (4, TILE_N)
    h3 = jax.nn.sigmoid(
        jnp.dot(w3, h2, preferred_element_type=jnp.float32) + b3)  # (1, TILE_N)

    o_ref[...] = h3.astype(o_ref.dtype)


def mlp_forward(x, param_slab, *, tile_n: int = 1024):
    """x: (N, 8) float array.  Returns (N, 1) = sigmoid MLP output."""
    n = x.shape[0]

    # Batch on lanes: (8, N). Single wrapper-side transpose (layout plumbing).
    x_t = x.astype(jnp.float32).T

    # Lane-dense tile; pad batch columns to a multiple of the tile.
    tn = min(tile_n, _round_up(n, 128))
    n_pad = _round_up(n, tn)
    if n_pad != n:
        x_t = jnp.pad(x_t, ((0, 0), (0, n_pad - n)))

    grid = (n_pad // tn,)

    out = pl.pallas_call(
        mlp_kernel,
        out_shape=jax.ShapeDtypeStruct((1, n_pad), jnp.float32),
        grid_spec=pltpu.PrefetchScalarGridSpec(
            num_scalar_prefetch=0,
            grid=grid,
            in_specs=[
                pl.BlockSpec((8, 128), lambda i: (0, 0)),   # packed params, resident
                pl.BlockSpec((8, tn), lambda i: (0, i)),    # batch tile of x.T
            ],
            out_specs=pl.BlockSpec((1, tn), lambda i: (0, i)),
        ),
        compiler_params=pltpu.CompilerParams(
            dimension_semantics=("parallel",),              # shard batch across TCs (v7x)
        ),
    )(param_slab, x_t)

    return out[0, :n].reshape(n, 1)


# -----------------------------------------------------------------------------
# Init / reference (PyTorch nn.Linear conventions)
# -----------------------------------------------------------------------------
def init_params(key):
    keys = jax.random.split(key, 6)

    def uniform_init(k, shape, fan_in):
        bound = 1.0 / jnp.sqrt(float(fan_in))
        return jax.random.uniform(k, shape, jnp.float32, -bound, bound)

    w1 = uniform_init(keys[0], (6, 8), 8)
    b1 = uniform_init(keys[1], (6,), 8)
    w2 = uniform_init(keys[2], (4, 6), 6)
    b2 = uniform_init(keys[3], (4,), 6)
    w3 = uniform_init(keys[4], (1, 4), 4)
    b3 = uniform_init(keys[5], (1,), 4)
    return (w1, b1, w2, b2, w3, b3)


def reference_forward(x, params):
    w1, b1, w2, b2, w3, b3 = params
    h = jax.nn.sigmoid(x @ w1.T + b1)
    h = jax.nn.sigmoid(h @ w2.T + b2)
    h = jax.nn.sigmoid(h @ w3.T + b3)
    return h


if __name__ == "__main__":
    key = jax.random.PRNGKey(0)
    pkey, xkey, xkey2 = jax.random.split(key, 3)

    params = init_params(pkey)
    slab = pack_params(params)

    # Small case matching the module's natural shape: batch=8, in_features=8.
    x = jax.random.normal(xkey, (8, 8), dtype=jnp.float32)
    out = mlp_forward(x, slab)
    jax.block_until_ready(out)
    ref = reference_forward(x, params)
    assert out.shape == (8, 1), out.shape
    assert jnp.allclose(out, ref, atol=1e-5, rtol=1e-5), "mismatch vs reference (small)"

    # Larger, non-multiple-of-tile batch to exercise the grid + padding path.
    x_big = jax.random.normal(xkey2, (2500, 8), dtype=jnp.float32)
    out_big = mlp_forward(x_big, slab)
    jax.block_until_ready(out_big)
    ref_big = reference_forward(x_big, params)
    assert out_big.shape == (2500, 1), out_big.shape
    assert jnp.allclose(out_big, ref_big, atol=1e-5, rtol=1e-5), "mismatch vs reference (big)"

    print("KERNEL_OK")
</pallas_src>

<mosaic_0001>
module attributes {stable_mosaic.version = 11 : i64} {
  func.func @mlp_kernel(%arg0: i32, %arg1: memref<8x128xf32, #tpu.memory_space<vmem>>, %arg2: memref<8x128xf32, #tpu.memory_space<vmem>>, %arg3: memref<1x128xf32, #tpu.memory_space<vmem>>) attributes {dimension_semantics = [#tpu.dimension_semantics<parallel>], iteration_bounds = array<i64: 1>, scalar_prefetch = 0 : i64, scratch_operands = 0 : i64, tpu.core_type = #tpu.core_type<tc>, window_params = [{pipeline_mode = #tpu.pipeline_mode<synchronous>, transform_indices = @transform_0, window_bounds = array<i64: 8, 128>}, {transform_indices = @transform_1, window_bounds = array<i64: 8, 128>}, {transform_indices = @transform_2, window_bounds = array<i64: 1, 128>}]} {
    %c0 = arith.constant 0 : index
    %c0_0 = arith.constant 0 : index
    %0 = vector.load %arg1[%c0, %c0_0] : memref<8x128xf32, #tpu.memory_space<vmem>>, vector<8x128xf32>
    %1 = vector.extract_strided_slice %0 {offsets = [0, 0], sizes = [6, 8], strides = [1, 1]} : vector<8x128xf32> to vector<6x8xf32>
    %2 = vector.extract_strided_slice %0 {offsets = [0, 8], sizes = [4, 6], strides = [1, 1]} : vector<8x128xf32> to vector<4x6xf32>
    %3 = vector.extract_strided_slice %0 {offsets = [0, 14], sizes = [1, 4], strides = [1, 1]} : vector<8x128xf32> to vector<1x4xf32>
    %4 = vector.extract_strided_slice %0 {offsets = [0, 120], sizes = [6, 1], strides = [1, 1]} : vector<8x128xf32> to vector<6x1xf32>
    %5 = vector.extract_strided_slice %0 {offsets = [0, 121], sizes = [4, 1], strides = [1, 1]} : vector<8x128xf32> to vector<4x1xf32>
    %6 = vector.extract_strided_slice %0 {offsets = [0, 122], sizes = [1, 1], strides = [1, 1]} : vector<8x128xf32> to vector<1x1xf32>
    %c0_1 = arith.constant 0 : index
    %c0_2 = arith.constant 0 : index
    %7 = vector.load %arg2[%c0_1, %c0_2] : memref<8x128xf32, #tpu.memory_space<vmem>>, vector<8x128xf32>
    %cst = arith.constant dense<0.000000e+00> : vector<6x128xf32>
    %8 = tpu.matmul %1, %7, %cst {dimension_numbers = #tpu.dot_dimension_numbers<[1], [0], [0], [1], [0, 0, 1, 1], [], []>} : vector<6x8xf32>, vector<8x128xf32>, vector<6x128xf32> -> vector<6x128xf32>
    %9 = vector.broadcast %4 : vector<6x1xf32> to vector<6x128xf32>
    %10 = arith.addf %8, %9 : vector<6x128xf32>
    %11 = arith.negf %10 : vector<6x128xf32>
    %12 = math.exp %11 : vector<6x128xf32>
    %cst_3 = arith.constant 1.000000e+00 : f32
    %13 = vector.broadcast %cst_3 : f32 to vector<6x128xf32>
    %14 = arith.addf %13, %12 : vector<6x128xf32>
    %15 = arith.divf %13, %14 : vector<6x128xf32>
    %cst_4 = arith.constant dense<0.000000e+00> : vector<4x128xf32>
    %16 = tpu.matmul %2, %15, %cst_4 {dimension_numbers = #tpu.dot_dimension_numbers<[1], [0], [0], [1], [0, 0, 1, 1], [], []>} : vector<4x6xf32>, vector<6x128xf32>, vector<4x128xf32> -> vector<4x128xf32>
    %17 = vector.broadcast %5 : vector<4x1xf32> to vector<4x128xf32>
    %18 = arith.addf %16, %17 : vector<4x128xf32>
    %19 = arith.negf %18 : vector<4x128xf32>
    %20 = math.exp %19 : vector<4x128xf32>
    %cst_5 = arith.constant 1.000000e+00 : f32
    %21 = vector.broadcast %cst_5 : f32 to vector<4x128xf32>
    %22 = arith.addf %21, %20 : vector<4x128xf32>
    %23 = arith.divf %21, %22 : vector<4x128xf32>
    %cst_6 = arith.constant dense<0.000000e+00> : vector<1x128xf32>
    %24 = tpu.matmul %3, %23, %cst_6 {dimension_numbers = #tpu.dot_dimension_numbers<[1], [0], [0], [1], [0, 0, 1, 1], [], []>} : vector<1x4xf32>, vector<4x128xf32>, vector<1x128xf32> -> vector<1x128xf32>
    %25 = vector.broadcast %6 : vector<1x1xf32> to vector<1x128xf32>
    %26 = arith.addf %24, %25 : vector<1x128xf32>
    %27 = arith.negf %26 : vector<1x128xf32>
    %28 = math.exp %27 : vector<1x128xf32>
    %cst_7 = arith.constant 1.000000e+00 : f32
    %29 = vector.broadcast %cst_7 : f32 to vector<1x128xf32>
    %30 = arith.addf %29, %28 : vector<1x128xf32>
    %31 = arith.divf %29, %30 : vector<1x128xf32>
    %c0_8 = arith.constant 0 : index
    %c0_9 = arith.constant 0 : index
    %32 = vector.load %arg3[%c0_8, %c0_9] : memref<1x128xf32, #tpu.memory_space<vmem>>, vector<1x128xf32>
    tpu.vector_store %arg3[%c0_8, %c0_9], %31 {strides = array<i32>} : memref<1x128xf32, #tpu.memory_space<vmem>>, vector<1x128xf32>,
    return
  }
  func.func @transform_0(%arg0: i32) -> (i32, i32) {
    %c0_i32 = arith.constant 0 : i32
    %c0_i32_0 = arith.constant 0 : i32
    %c0_i32_1 = arith.constant 0 : i32
    return %c0_i32, %c0_i32_0 : i32, i32
  }
  func.func @transform_1(%arg0: i32) -> (i32, i32) {
    %c0_i32 = arith.constant 0 : i32
    %c0_i32_0 = arith.constant 0 : i32
    return %c0_i32, %arg0 : i32, i32
  }
  func.func @transform_2(%arg0: i32) -> (i32, i32) {
    %c0_i32 = arith.constant 0 : i32
    %c0_i32_0 = arith.constant 0 : i32
    return %c0_i32, %arg0 : i32, i32
  }
}

</mosaic_0001>

<bundles_post_ra>
// kernel: tpu_custom_call.1
= control target key start
LH: loop header
LB: loop body
LE: loop exit
PB: predicated region body
PF: predicated region fallthrough
CT: control target
= control target key end

     0   :  { %7 = vsyncpa [#allocation3], 0  ;;  %s354_s0 = inlined_call_operand.hbm [shape: f32[8,128], index: 0, kind: input, shape index: {}]   ;;  %s355_s1 = inlined_call_operand.hbm [shape: f32[8,128], index: 1, kind: input, shape index: {}]   ;;  %s356_s2 = inlined_call_operand.hbm [shape: f32[1,128], index: 2, kind: output, shape index: {}]  }
   0x1   :  { %8 = vsyncpa [#allocation6], 0 }
   0x2   :  { %9 = vsyncpa [#allocation4], 0  ;;  %s15_s11 = sshll.u32 %s354_s0, 4  ;;  %s322_s12 = smov [#allocation2]   ;;  %s16_s11 = int_to_ptr.hbm [resolvable:$true] %s15_s11 }
   0x3   :  { %s17_s13 = sshll.u32 %s322_s12, 4  ;;  %s26_s16 = sshll.u32 %s355_s1, 4  ;;  %s18_s13 = int_to_ptr.vmem [resolvable:$true] %s17_s13  ;;  %s27_s16 = int_to_ptr.hbm [resolvable:$true] %s26_s16 }
   0x4   :  { %20 = dma.hbm_to_vmem [thread:$0]  %s16_s11, 128, %s18_s13, [#allocation3]  }
   0x5   :  { %s323_s17 = smov [#allocation5]  }
   0x6   :  { %s28_s18 = sshll.u32 %s323_s17, 4  ;;  %s29_s18 = int_to_ptr.vmem [resolvable:$true] %s28_s18 }
   0x7   :  { %31 = dma.hbm_to_vmem [thread:$0]  %s27_s16, 128, %s29_s18, [#allocation6]  }
   0x8   :  { %316 = dma.done.wait [#allocation3], 128  }
   0x9   :  { %317 = vsyncadd [#allocation3], 4294967168 }
   0xa   :  { %318 = dma.done.wait [#allocation6], 128  }
   0xb   :  { %319 = vsyncadd [#allocation6], 4294967168  ;;  %v324_v0 = vmov 120   ;;  %vm47_vm0 = vcmask 64512   ;;  %v41_v1 = vld [vmem:[#allocation5] sm:$0xff]  ;;  %v40_v2 = vld [vmem:[#allocation2] sm:$0xff] }
   0xc   :  { %228 = vset.pattern.permute.xlu0 %v324_v0  ;;  %65 = vmatpush.msra.mxu0 %v41_v1  ;;  %s325_s0 = smov 120   ;;  %v326_v6 = vmov 121   ;;  %s327_s1 = smov 114   ;;  %vm98_vm4 = vcmask 1045504   ;;  %vm95_vm6 = vcmask 48128   ;;  %v328_v24 = vmov 122  }
   0xd   :  { %44 = vperm.xlu0 %228, %v40_v2   ;;  %212 = vmatmul.msk.f32.vlgmr.msra.gmra.mxu0 %vm47_vm0, %v40_v2  ;;  %vm150_vm10 = vcmask 1043456   ;;  %vm147_vm12 = vcmask 31744   ;;  %s329_s19 = smov [#allocation7]   ;;  %s201_s23 = sshll.u32 %s356_s2, 4  ;;  %s202_s23 = int_to_ptr.hbm [resolvable:$true] %s201_s23 }
   0xe   :  { %229 = vset.pattern.permute.xlu1 %v326_v6  ;;  %230 = vset.pattern.permute.xlu2 %v328_v24  ;;  %s199_s20 = sshll.u32 %s329_s19, 4  ;;  %s200_s20 = int_to_ptr.vmem [resolvable:$true] %s199_s20 }
   0xf   :  { %90 = vperm.xlu1 %229, %v40_v2   ;;  %142 = vperm.xlu2 %230, %v40_v2  }
  0x15   :  { %93 = vrot.lane.b32.xlu0 %v40_v2, %s325_s0 }
  0x16   :  { %231 = vset.pattern.permute.xlu0 %v328_v24 }
  0x17   :  { %145 = vrot.lane.b32.xlu1 %v40_v2, %s327_s1 }
  0x69   :  { %v143_v39 = vpop.permute.xlu2 %142 }
  0x7f   :  { %v45_v3 = vpop.permute.xlu0 %44 }
  0x81   :  { %v91_v21 = vpop.permute.xlu1 %90 }
  0x87   :  { %v94_v18 = vpop.permute.xlu0 %93 }
  0x89   :  { %v146_v36 = vpop.permute.xlu1 %145 }
  0x8a   :  { %v67_v4 = vpop.f32.mrf.mxu0 }
  0x8b   :  { %v68_v5 = vadd.f32 %v67_v4, %v45_v3 }
  0x8d   :  { %v213_v7 = vmul.f32 -1.442695, %v68_v5 }
  0x8f   :  { %232 = vpow2.f32 %v213_v7 }
  0x95   :  { %v233_v8 = vpop.eup %232 }
  0x96   :  { %v73_v9 = vadd.f32 1.0, %v233_v8 }
  0x98   :  { %234 = vrcp.f32 %v73_v9  ;;  %v85_v13 = vand.u32 2147483648, %v73_v9  ;;  %v83_v15 = vand.u32 2147483647, %v73_v9  ;;  %vm79_vm2 = vweird.f32 %v73_v9 }
  0x9a   :  { %v86_v17 = vor.u32 1.1754944e-38, %v85_v13  ;;  %vm84_vm5 = vcmp.eq.f32.partialorder %v83_v15, 8.507059e+37 }
  0x9e   :  { %v235_v10 = vpop.eup %234 }
  0x9f   :  { %v75_v11 = vmul.f32 %v235_v10, %v73_v9  ;;  %vm80_vm1 = vweird.f32 %v235_v10 }
  0xa0   :  { %vm81_vm3 = vmor %vm79_vm2, %vm80_vm1 }
  0xa1   :  { %v76_v12 = vsub.f32 1.0, %v75_v11 }
  0xa3   :  { %v77_v14 = vmul.f32 %v235_v10, %v76_v12 }
  0xa5   :  { %v78_v16 = vadd.f32 %v235_v10, %v77_v14 }
  0xa7   :  { %v82_v19 = vsel %vm81_vm3, %v235_v10, %v78_v16 }
  0xa8   :  { %v87_v20 = vsel %vm84_vm5, %v86_v17, %v82_v19 }
  0xa9   :  { %214 = vmatpush.msk.msra.mxu1 %vm98_vm4, %v87_v20 }
  0xaa   :  { %215 = vmatmul.msk.f32.vlgmr.msra.gmra.mxu1 %vm95_vm6, %v94_v18 }
 0x127   :  { %v119_v22 = vpop.f32.mrf.mxu1 }
 0x128   :  { %v120_v23 = vadd.f32 %v119_v22, %v91_v21 }
 0x12a   :  { %v216_v25 = vmul.f32 -1.442695, %v120_v23 }
 0x12c   :  { %236 = vpow2.f32 %v216_v25 }
 0x132   :  { %v237_v26 = vpop.eup %236 }
 0x133   :  { %v125_v27 = vadd.f32 1.0, %v237_v26 }
 0x135   :  { %238 = vrcp.f32 %v125_v27  ;;  %v137_v31 = vand.u32 2147483648, %v125_v27  ;;  %v135_v33 = vand.u32 2147483647, %v125_v27  ;;  %vm131_vm8 = vweird.f32 %v125_v27 }
 0x137   :  { %v138_v35 = vor.u32 1.1754944e-38, %v137_v31  ;;  %vm136_vm11 = vcmp.eq.f32.partialorder %v135_v33, 8.507059e+37 }
 0x13b   :  { %v239_v28 = vpop.eup %238 }
 0x13c   :  { %v127_v29 = vmul.f32 %v239_v28, %v125_v27  ;;  %vm132_vm7 = vweird.f32 %v239_v28 }
 0x13d   :  { %vm133_vm9 = vmor %vm131_vm8, %vm132_vm7 }
 0x13e   :  { %v128_v30 = vsub.f32 1.0, %v127_v29 }
 0x140   :  { %v129_v32 = vmul.f32 %v239_v28, %v128_v30 }
 0x142   :  { %v130_v34 = vadd.f32 %v239_v28, %v129_v32 }
 0x144   :  { %v134_v37 = vsel %vm133_vm9, %v239_v28, %v130_v34 }
 0x145   :  { %v139_v38 = vsel %vm136_vm11, %v138_v35, %v134_v37 }
 0x146   :  { %217 = vmatpush.msk.msra.mxu2 %vm150_vm10, %v139_v38 }
 0x147   :  { %218 = vmatmul.msk.f32.vlgmr.msra.gmra.mxu2 %vm147_vm12, %v146_v36 }
 0x1ca   :  { %v171_v40 = vpop.f32.mrf.mxu2 }
 0x1cb   :  { %v172_v41 = vadd.f32 %v171_v40, %v143_v39 }
 0x1cd   :  { %v219_v42 = vmul.f32 -1.442695, %v172_v41 }
 0x1cf   :  { %240 = vpow2.f32 %v219_v42 }
 0x1d5   :  { %v241_v43 = vpop.eup %240 }
 0x1d6   :  { %v177_v44 = vadd.f32 1.0, %v241_v43 }
 0x1d8   :  { %242 = vrcp.f32 %v177_v44  ;;  %v189_v48 = vand.u32 2147483648, %v177_v44  ;;  %v187_v50 = vand.u32 2147483647, %v177_v44  ;;  %vm183_vm14 = vweird.f32 %v177_v44 }
 0x1da   :  { %v190_v52 = vor.u32 1.1754944e-38, %v189_v48  ;;  %vm188_vm0 = vcmp.eq.f32.partialorder %v187_v50, 8.507059e+37 }
 0x1de   :  { %v243_v45 = vpop.eup %242 }
 0x1df   :  { %v179_v46 = vmul.f32 %v243_v45, %v177_v44  ;;  %vm184_vm13 = vweird.f32 %v243_v45 }
 0x1e0   :  { %vm185_vm15 = vmor %vm183_vm14, %vm184_vm13 }
 0x1e1   :  { %v180_v47 = vsub.f32 1.0, %v179_v46 }
 0x1e3   :  { %v181_v49 = vmul.f32 %v243_v45, %v180_v47 }
 0x1e5   :  { %v182_v51 = vadd.f32 %v243_v45, %v181_v49 }
 0x1e7   :  { %v186_v53 = vsel %vm185_vm15, %v243_v45, %v182_v51 }
 0x1e8   :  { %v191_v54 = vsel %vm188_vm0, %v190_v52, %v186_v53 }
 0x1e9   :  { %193 = vst [vmem:[#allocation7] sm:$0x1] %v191_v54 }
 0x1ea   :  { %204 = dma.vmem_to_hbm [thread:$0]  %s200_s20, 16, %s202_s23, [#allocation4]  }
 0x1eb   :  { %320 = dma.done.wait [#allocation4], 16  }
 0x1ec   :  { %321 = vsyncadd [#allocation4], 4294967280 }
 0x1ed   :  { %209 = vsyncpa [#allocation3], 1 }
 0x1ee   :  { %210 = vsyncpa [#allocation6], 1 }
 0x1ef   :  { %211 = vsyncpa [#allocation4], 1 }

</bundles_post_ra>
